<compile_context>
chip_gen: v7x
topology: tpu7x:2x2x1
jax: 0.10.0
libtpu: 0.0.40
codegen_flags: <defaults>
</compile_context>

<pallas_src>
import jax
import jax.numpy as jnp
from jax.experimental import pallas as pl
from jax.experimental.pallas import tpu as pltpu

EPS = 1e-6


def _sublayer_body(x_ref, xres_ref, a2_ref, b2_ref, w_ref, bw_ref, o_ref, normed_ref):
    """Shared body. x_ref: (tm, H); w_ref: (H, tn); bw_ref: (1, tn);
    o_ref: (tm, tn); normed_ref: (tm, H) bf16 scratch.
    xres_ref is None when tn == H (the x block itself is the residual)."""
    j = pl.program_id(1)
    H = x_ref.shape[-1]

    # LayerNorm once per row tile (j == 0), reused for every column tile j.
    @pl.when(j == 0)
    def _():
        x = x_ref[...].astype(jnp.float32)
        mean = jnp.mean(x, axis=-1, keepdims=True)
        c = x - mean
        # torch.std -> unbiased (N-1); eps added to std, matching the module.
        var = jnp.sum(c * c, axis=-1, keepdims=True) * (1.0 / (H - 1))
        inv = pl.reciprocal(jnp.sqrt(var) + EPS, approx=False)   # exact, EUP slot
        normed = a2_ref[...] * (c * inv) + b2_ref[...]
        normed_ref[...] = normed.astype(normed_ref.dtype)

    # sublayer: Linear(H, H) column tile on the MXU (bf16 operands, f32 acc).
    sub = jnp.dot(normed_ref[...], w_ref[...], preferred_element_type=jnp.float32)
    sub = sub + bw_ref[...].astype(jnp.float32)

    # dropout (eval mode) = identity; residual add.
    res_ref = x_ref if xres_ref is None else xres_ref
    o_ref[...] = (res_ref[...].astype(jnp.float32) + sub).astype(o_ref.dtype)


def _make_kernel(column_tiled):
    if column_tiled:
        def kernel(x_ref, xres_ref, a2_ref, b2_ref, w_ref, bw_ref, o_ref, normed_ref):
            _sublayer_body(x_ref, xres_ref, a2_ref, b2_ref, w_ref, bw_ref, o_ref, normed_ref)
    else:
        def kernel(x_ref, a2_ref, b2_ref, w_ref, bw_ref, o_ref, normed_ref):
            _sublayer_body(x_ref, None, a2_ref, b2_ref, w_ref, bw_ref, o_ref, normed_ref)
    return kernel


def prepare_sublayer_params(a2, b2, w, bw):
    """One-time parameter prep (hoisted out of the per-call path): (1, H) f32
    vectors and a bf16 copy of the Linear weight (half the VMEM, native MXU)."""
    H = w.shape[0]
    return (jnp.asarray(a2, jnp.float32).reshape(1, H),
            jnp.asarray(b2, jnp.float32).reshape(1, H),
            jnp.asarray(w, jnp.bfloat16),
            jnp.asarray(bw, jnp.float32).reshape(1, H))


def sublayer_connection(x, params, *, target_tm=None, force_tn=None):
    """x: [B, S, H]; params from prepare_sublayer_params  ->  [B, S, H]."""
    a2p, b2p, w_bf16, bwp = params
    B, S, H = x.shape
    M = B * S
    x2 = x.reshape(M, H)
    itemsize = x2.dtype.itemsize

    # Per-generation VMEM budget (v5e/v6e: 128 MiB, v7x: 64 MiB) with headroom.
    try:
        vmem_cap = int(pltpu.get_tpu_info().vmem_capacity_bytes)
    except Exception:
        vmem_cap = 64 * 1024 * 1024
    budget = int(vmem_cap * 0.75)

    # Column tiling of the weight: only when a single resident copy would eat
    # too much of the budget (large H), or when explicitly forced (for tests).
    if force_tn is not None:
        assert H % force_tn == 0 and force_tn % 128 == 0
        column_tiled, tn = True, force_tn
    elif H * H * 2 > budget // 3 and H % 128 == 0:
        column_tiled = True
        tn = next(t for t in (512, 256, 128) if H % t == 0)
    else:
        column_tiled, tn = False, H

    def vmem_use(tm_):
        use = 2 * tm_ * H * itemsize            # x blocks (double-buffered)
        use += 2 * tm_ * tn * itemsize          # out blocks
        use += tm_ * H * 2                      # bf16 normed scratch
        use += 2 * 2 * H * 4 + 2 * tn * 4       # a_2/b_2 resident + bias blocks
        if column_tiled:
            use += 2 * H * tn * 2               # weight column blocks
            use += 2 * tm_ * tn * itemsize      # x residual blocks
        else:
            use += H * H * 2                    # resident weight, single copy
        return use

    # Row tile: as big as the budget allows (mem-bound -> amortize per-step
    # overhead and per-DMA cost), multiple of 8, ragged last block via cdiv.
    if target_tm is None:
        target_tm = 1024 if H <= 1024 else 512
    if M <= 8:
        tm = M
    else:
        tm = max(8, (min(target_tm, M) // 8) * 8)
        while tm > 8 and vmem_use(tm) > budget:
            tm = max(8, (tm // 2 // 8) * 8)
        # v7x megacore: keep >= 2 steps on the parallel row axis.
        if pl.cdiv(M, tm) < 2:
            tm = max(8, -(-((M + 1) // 2) // 8) * 8)

    grid = (pl.cdiv(M, tm), H // tn)

    vmem_full = pl.BlockSpec(memory_space=pltpu.MemorySpace.VMEM)
    x_spec = pl.BlockSpec((tm, H), lambda i, j: (i, 0))
    bw_spec = pl.BlockSpec((1, tn), lambda i, j: (0, j))
    out_spec = pl.BlockSpec((tm, tn), lambda i, j: (i, j))
    if column_tiled:
        w_spec = pl.BlockSpec((H, tn), lambda i, j: (0, j))
        xres_spec = pl.BlockSpec((tm, tn), lambda i, j: (i, j))
        in_specs = [x_spec, xres_spec, vmem_full, vmem_full, w_spec, bw_spec]
        args = (x2, x2, a2p, b2p, w_bf16, bwp)
    else:
        in_specs = [x_spec, vmem_full, vmem_full, vmem_full, bw_spec]
        args = (x2, a2p, b2p, w_bf16, bwp)

    w_hbm_reads = (grid[0] if column_tiled else 1) * H * H * 2
    cost = pl.CostEstimate(
        flops=2 * M * H * H + 8 * M * H,
        transcendentals=2 * M,                              # sqrt + reciprocal / row
        bytes_accessed=(3 if column_tiled else 2) * M * H * itemsize
                       + w_hbm_reads + 4 * H * 4,
    )

    out = pl.pallas_call(
        _make_kernel(column_tiled),
        out_shape=jax.ShapeDtypeStruct((M, H), x.dtype),
        grid_spec=pltpu.PrefetchScalarGridSpec(
            num_scalar_prefetch=0,
            grid=grid,
            in_specs=in_specs,
            out_specs=out_spec,
            scratch_shapes=[pltpu.VMEM((tm, H), jnp.bfloat16)],
        ),
        compiler_params=pltpu.CompilerParams(
            dimension_semantics=("parallel", "arbitrary"),
            vmem_limit_bytes=int(vmem_cap * 0.8)),
        cost_estimate=cost,
    )(*args)
    return out.reshape(B, S, H)


def reference(x, a2, b2, w, bw):
    # Pure-JAX f32 reference matching the PyTorch forward exactly.
    x32 = x.astype(jnp.float32)
    mean = jnp.mean(x32, axis=-1, keepdims=True)
    var = jnp.sum((x32 - mean) ** 2, axis=-1, keepdims=True) / (x.shape[-1] - 1)
    std = jnp.sqrt(var)
    normed = a2 * (x32 - mean) / (std + EPS) + b2
    sub = normed @ w.astype(jnp.float32) + bw
    return (x32 + sub).astype(x.dtype)


if __name__ == "__main__":
    key = jax.random.PRNGKey(0)
    k1, k2, k3, k4, k5 = jax.random.split(key, 5)

    # Case 1: typical small transformer shape -> resident-weight path.
    B, S, H = 2, 8, 128
    x = jax.random.normal(k1, (B, S, H), dtype=jnp.float32)
    a2 = jnp.ones((H,), dtype=jnp.float32)       # LayerNorm init: ones / zeros
    b2 = jnp.zeros((H,), dtype=jnp.float32)
    w = jax.random.normal(k2, (H, H), dtype=jnp.float32) / jnp.sqrt(H)
    bw = jax.random.normal(k3, (H,), dtype=jnp.float32) * 0.01
    params = prepare_sublayer_params(a2, b2, w, bw)

    out = jax.block_until_ready(sublayer_connection(x, params))
    ref = reference(x, a2, b2, w, bw)
    assert out.shape == (B, S, H)
    # Tolerance reflects bf16 MXU operands (f32 accumulation); LN math is f32.
    assert jnp.allclose(out, ref, atol=5e-2, rtol=5e-2), "case 1 mismatch"

    # Case 2: exercise the column-tiled (large-H) weight path at a small size.
    H2 = 256
    xb = jax.random.normal(k4, (2, 8, H2), dtype=jnp.float32)
    a2b = 1.0 + 0.1 * jax.random.normal(k5, (H2,), dtype=jnp.float32)
    b2b = 0.1 * jax.random.normal(k1, (H2,), dtype=jnp.float32)
    wb = jax.random.normal(k2, (H2, H2), dtype=jnp.float32) / jnp.sqrt(H2)
    bwb = jax.random.normal(k3, (H2,), dtype=jnp.float32) * 0.01
    paramsb = prepare_sublayer_params(a2b, b2b, wb, bwb)

    outb = jax.block_until_ready(sublayer_connection(xb, paramsb, force_tn=128))
    refb = reference(xb, a2b, b2b, wb, bwb)
    assert jnp.allclose(outb, refb, atol=5e-2, rtol=5e-2), "case 2 mismatch"

    print("KERNEL_OK")
</pallas_src>

<mosaic_0001>
module attributes {stable_mosaic.version = 11 : i64} {
  func.func @kernel(%arg0: i32, %arg1: i32, %arg2: memref<8x128xf32, #tpu.memory_space<vmem>>, %arg3: memref<1x128xf32, #tpu.memory_space<vmem>>, %arg4: memref<1x128xf32, #tpu.memory_space<vmem>>, %arg5: memref<128x128xbf16, #tpu.memory_space<vmem>>, %arg6: memref<1x128xf32, #tpu.memory_space<vmem>>, %arg7: memref<8x128xf32, #tpu.memory_space<vmem>>, %arg8: memref<8x128xbf16, #tpu.memory_space<vmem>>) attributes {dimension_semantics = [#tpu.dimension_semantics<parallel>, #tpu.dimension_semantics<arbitrary>], iteration_bounds = array<i64: 2, 1>, scalar_prefetch = 0 : i64, scratch_operands = 1 : i64, tpu.core_type = #tpu.core_type<tc>, window_params = [{transform_indices = @transform_0, window_bounds = array<i64: 8, 128>}, {pipeline_mode = #tpu.pipeline_mode<synchronous>, transform_indices = @transform_1, window_bounds = array<i64: 1, 128>}, {pipeline_mode = #tpu.pipeline_mode<synchronous>, transform_indices = @transform_2, window_bounds = array<i64: 1, 128>}, {pipeline_mode = #tpu.pipeline_mode<synchronous>, transform_indices = @transform_3, window_bounds = array<i64: 128, 128>}, {transform_indices = @transform_4, window_bounds = array<i64: 1, 128>}, {transform_indices = @transform_5, window_bounds = array<i64: 8, 128>}]} {
    %c0_i32 = arith.constant 0 : i32
    %0 = arith.cmpi eq, %arg1, %c0_i32 : i32
    %1 = arith.extui %0 : i1 to i32
    %c0_i32_0 = arith.constant 0 : i32
    %2 = arith.cmpi ne, %1, %c0_i32_0 : i32
    scf.if %2 {
      %c0_10 = arith.constant 0 : index
      %c0_11 = arith.constant 0 : index
      %12 = vector.load %arg2[%c0_10, %c0_11] : memref<8x128xf32, #tpu.memory_space<vmem>>, vector<8x128xf32>
      %cst_12 = arith.constant dense<0.000000e+00> : vector<8xf32>
      %13 = vector.multi_reduction <add>, %12, %cst_12 [1] : vector<8x128xf32> to vector<8xf32>
      %14 = vector.shape_cast %13 : vector<8xf32> to vector<8x1xf32>
      %cst_13 = arith.constant 1.280000e+02 : f32
      %15 = vector.broadcast %cst_13 : f32 to vector<8x1xf32>
      %16 = arith.divf %14, %15 : vector<8x1xf32>
      %17 = vector.broadcast %16 : vector<8x1xf32> to vector<8x128xf32>
      %18 = arith.subf %12, %17 : vector<8x128xf32>
      %19 = arith.mulf %18, %18 : vector<8x128xf32>
      %cst_14 = arith.constant dense<0.000000e+00> : vector<8xf32>
      %20 = vector.multi_reduction <add>, %19, %cst_14 [1] : vector<8x128xf32> to vector<8xf32>
      %21 = vector.shape_cast %20 : vector<8xf32> to vector<8x1xf32>
      %cst_15 = arith.constant 0.00787401571 : f32
      %22 = vector.broadcast %cst_15 : f32 to vector<8x1xf32>
      %23 = arith.mulf %21, %22 : vector<8x1xf32>
      %24 = math.sqrt %23 : vector<8x1xf32>
      %cst_16 = arith.constant 9.99999997E-7 : f32
      %25 = vector.broadcast %cst_16 : f32 to vector<8x1xf32>
      %26 = arith.addf %24, %25 : vector<8x1xf32>
      %27 = tpu.reciprocal %26 : vector<8x1xf32> -> vector<8x1xf32>
      %c0_17 = arith.constant 0 : index
      %c0_18 = arith.constant 0 : index
      %28 = vector.load %arg3[%c0_17, %c0_18] : memref<1x128xf32, #tpu.memory_space<vmem>>, vector<1x128xf32>
      %29 = vector.broadcast %27 : vector<8x1xf32> to vector<8x128xf32>
      %30 = arith.mulf %18, %29 : vector<8x128xf32>
      %31 = vector.broadcast %28 : vector<1x128xf32> to vector<8x128xf32>
      %32 = arith.mulf %31, %30 : vector<8x128xf32>
      %c0_19 = arith.constant 0 : index
      %c0_20 = arith.constant 0 : index
      %33 = vector.load %arg4[%c0_19, %c0_20] : memref<1x128xf32, #tpu.memory_space<vmem>>, vector<1x128xf32>
      %34 = vector.broadcast %33 : vector<1x128xf32> to vector<8x128xf32>
      %35 = arith.addf %32, %34 : vector<8x128xf32>
      %36 = arith.truncf %35 : vector<8x128xf32> to vector<8x128xbf16>
      %c0_21 = arith.constant 0 : index
      %c0_22 = arith.constant 0 : index
      %37 = vector.load %arg8[%c0_21, %c0_22] : memref<8x128xbf16, #tpu.memory_space<vmem>>, vector<8x128xbf16>
      tpu.vector_store %arg8[%c0_21, %c0_22], %36 {strides = array<i32>} : memref<8x128xbf16, #tpu.memory_space<vmem>>, vector<8x128xbf16>,
    } else {
    }
    %c0 = arith.constant 0 : index
    %c0_1 = arith.constant 0 : index
    %3 = vector.load %arg8[%c0, %c0_1] : memref<8x128xbf16, #tpu.memory_space<vmem>>, vector<8x128xbf16>
    %c0_2 = arith.constant 0 : index
    %c0_3 = arith.constant 0 : index
    %4 = vector.load %arg5[%c0_2, %c0_3] : memref<128x128xbf16, #tpu.memory_space<vmem>>, vector<128x128xbf16>
    %cst = arith.constant dense<0.000000e+00> : vector<8x128xf32>
    %5 = tpu.matmul %3, %4, %cst {dimension_numbers = #tpu.dot_dimension_numbers<[1], [0], [0], [1], [0, 0, 1, 1], [], []>} : vector<8x128xbf16>, vector<128x128xbf16>, vector<8x128xf32> -> vector<8x128xf32>
    %c0_4 = arith.constant 0 : index
    %c0_5 = arith.constant 0 : index
    %6 = vector.load %arg6[%c0_4, %c0_5] : memref<1x128xf32, #tpu.memory_space<vmem>>, vector<1x128xf32>
    %7 = vector.broadcast %6 : vector<1x128xf32> to vector<8x128xf32>
    %8 = arith.addf %5, %7 : vector<8x128xf32>
    %c0_6 = arith.constant 0 : index
    %c0_7 = arith.constant 0 : index
    %9 = vector.load %arg2[%c0_6, %c0_7] : memref<8x128xf32, #tpu.memory_space<vmem>>, vector<8x128xf32>
    %10 = arith.addf %9, %8 : vector<8x128xf32>
    %c0_8 = arith.constant 0 : index
    %c0_9 = arith.constant 0 : index
    %11 = vector.load %arg7[%c0_8, %c0_9] : memref<8x128xf32, #tpu.memory_space<vmem>>, vector<8x128xf32>
    tpu.vector_store %arg7[%c0_8, %c0_9], %10 {strides = array<i32>} : memref<8x128xf32, #tpu.memory_space<vmem>>, vector<8x128xf32>,
    return
  }
  func.func @transform_0(%arg0: i32, %arg1: i32) -> (i32, i32) {
    %c0_i32 = arith.constant 0 : i32
    %c0_i32_0 = arith.constant 0 : i32
    return %arg0, %c0_i32 : i32, i32
  }
  func.func @transform_1(%arg0: i32, %arg1: i32) -> (i32, i32) {
    %c0_i32 = arith.constant 0 : i32
    %c0_i32_0 = arith.constant 0 : i32
    %c0_i32_1 = arith.constant 0 : i32
    return %c0_i32, %c0_i32_0 : i32, i32
  }
  func.func @transform_2(%arg0: i32, %arg1: i32) -> (i32, i32) {
    %c0_i32 = arith.constant 0 : i32
    %c0_i32_0 = arith.constant 0 : i32
    %c0_i32_1 = arith.constant 0 : i32
    return %c0_i32, %c0_i32_0 : i32, i32
  }
  func.func @transform_3(%arg0: i32, %arg1: i32) -> (i32, i32) {
    %c0_i32 = arith.constant 0 : i32
    %c0_i32_0 = arith.constant 0 : i32
    %c0_i32_1 = arith.constant 0 : i32
    return %c0_i32, %c0_i32_0 : i32, i32
  }
  func.func @transform_4(%arg0: i32, %arg1: i32) -> (i32, i32) {
    %c0_i32 = arith.constant 0 : i32
    %c0_i32_0 = arith.constant 0 : i32
    return %c0_i32, %arg1 : i32, i32
  }
  func.func @transform_5(%arg0: i32, %arg1: i32) -> (i32, i32) {
    %c0_i32 = arith.constant 0 : i32
    return %arg0, %arg1 : i32, i32
  }
}

</mosaic_0001>

<bundles_post_ra>
// kernel: tpu_custom_call.1
= control target key start
LH: loop header
LB: loop body
LE: loop exit
PB: predicated region body
PF: predicated region fallthrough
CT: control target
= control target key end

     0   :  { %10 = vsyncpa [#allocation4], 0  ;;  %s1117_s0 = inlined_call_operand.hbm [shape: f32[16,128], index: 0, kind: input, shape index: {}]   ;;  %s1118_s1 = inlined_call_operand.vmem [shape: f32[1,128], index: 1, kind: input, shape index: {}]   ;;  %s1119_s2 = inlined_call_operand.vmem [shape: f32[1,128], index: 2, kind: input, shape index: {}]   ;;  %s1120_s3 = inlined_call_operand.hbm [shape: bf16[128,128], index: 3, kind: input, shape index: {}]   ;;  %s1121_s4 = inlined_call_operand.vmem [shape: f32[1,128], index: 4, kind: input, shape index: {}]   ;;  %s1122_s5 = inlined_call_operand.hbm [shape: f32[16,128], index: 5, kind: output, shape index: {}]  }
   0x1   :  { %12 = vsyncpa [#allocation4 + $0x1], 0 }
   0x2   :  { %13 = vsyncpa [#allocation7], 0 }
   0x3   :  { %14 = vsyncpa [#allocation5], 0 }
   0x4   :  { %16 = vsyncpa [#allocation5 + $0x1], 0  ;;  %s885_s18 = smov 0   ;;  %s887_s19 = smov 0  }
   0x5   :  { %s889_s20 = smov 0   ;;  %s891_s21 = smov 0  }
   0x6   :  { %s893_s22 = smov 0   ;;  %s895_s23 = smov 0  }
   0x7 LB: > { %s557_s24 = sadd.s32 4294967295, %s846_s23   ;;  %s558_s25 = sadd.s32 4294967294, %s846_s23   ;;  %s846_s23 = sphi %s895_s23, %s22_s23   ;;  %s842_s22 = sphi %s893_s22, %s1146_s22   ;;  %s838_s21 = sphi %s891_s21, %s1145_s21   ;;  %s834_s20 = sphi %s889_s20, %s1144_s20   ;;  %s830_s19 = sphi %s887_s19, %s1143_s19   ;;  %s826_s18 = sphi %s885_s18, %s1142_s18  }
   0x8   : > { %p54_p0 = scmp.ne.s32.totalorder %s830_s19, %s826_s18  ;;  %p919_p1 = scmp.eq.s32.totalorder %s557_s24, 0 }
   0x9   : > { %p923_p2 = scmp.eq.s32.totalorder %s557_s24, 1  ;;  %p175_p3 = scmp.eq.s32.totalorder %s558_s25, 1 }
   0xa   : > { %s1127_s26 = scalar_select %p919_p1, 1, 0 }
   0xb   : > { %s1128_s27 = scalar_select %p923_p2, 1, 0 }
   0xc   : > { %p929_p4 = por %p919_p1, %p54_p0  ;;  %p559_p5 = scmp.ge.s32.totalorder %s846_s23, 1 }
   0xd   : > { %p934_p6 = por %p175_p3, %p54_p0  ;;  %p182_p7 = scmp.lt.s32.totalorder %s846_s23, 3 }
   0xe   : > { %s1129_s28 = scalar_select %p929_p4, 1, 0 }
   0xf   : > { %s1130_s29 = scalar_select %p934_p6, 1, 0 }
  0x10   : > { %p939_p8 = pnand %p559_p5, %p182_p7  ;;  %s848_s6 = smov [#allocation6]  }
  0x11   : > { %s200_s7 = sshll.u32 %s848_s6, 4  ;;  %s34_s9 = sadd.s32 1, %s842_s22  ;;  %s201_s7 = int_to_ptr.vmem [resolvable:$true] %s200_s7 }
  0x12   : > { %s1131_s30 = scalar_select %p939_p8, 1, 0 }
  0x13   : > { %p621_p9 = pneg %p939_p8  ;;  %s702_s12 = scalar_lea.hbm %s1120_s3, 1024 }
  0x14   : > { %p703_p12 = scmp.ne.s32.totalorder %s1120_s3, %s702_s12  ;;  %p709_p5 = scmp.lt.u32.totalorder %s702_s12, %s1120_s3 }
  0x15   : > { %p948_p11 = pnand %p621_p9, %p919_p1 }
  0x17   : > { %p704_p13 = pneg %p948_p11 }
  0x19   : > { %p705_p0 = pnand %p704_p13, %p703_p12 }
  0x1b   : > { %p706_p3 = pneg %p705_p0 }
  0x1d   : > { %p711_p7 = pnand %p709_p5, %p706_p3 }
  0x1f   : > { %714 = shalt.err (!%p711_p7)
}
  0x20   : > { %s715_s17 = scalar_lea.vmem %s201_s7, 1024  ;;  %p723_p1 = scmp.lt.s32.totalorder %s201_s7, %s201_s7 }
  0x21   : > { %p716_p9 = scmp.ne.s32.totalorder %s201_s7, %s715_s17  ;;  %p724_p4 = scmp.lt.s32.totalorder %s715_s17, %s715_s17 }
  0x23   : > { %p718_p10 = pnand %p716_p9, %p704_p13  ;;  %p725_p8 = por %p724_p4, %p723_p1 }
  0x25   : > { %p719_p6 = pneg %p718_p10 }
  0x27   : > { %p726_p2 = pnand %p725_p8, %p719_p6 }
  0x29   : > { %729 = shalt.err (!%p726_p2)
}
  0x2a   : > { %s849_s24 = smov 64   ;;  %s850_s25 = smov 4  }
  0x2b   : > { %624 = dma.hbm_to_vmem [thread:$0]  (!%p948_p11), %s1120_s3, 1024, %s201_s7, [#allocation7], %s849_s24, %s849_s24, %s850_s25  }
  0x2c   : > { %p36_p1 = scmp.ge.s32.totalorder %s34_s9, 2  ;;  %s41_s11 = sadd.s32 1, %s834_s20 }
  0x2d   : > { %p48_p2 = scmp.ne.s32.totalorder %s834_s20, %s830_s19  ;;  %p49_p4 = scmp.eq.s32.totalorder %s846_s23, 0 }
  0x2e   : > { %s1148_s9 = smov (%p36_p1, %s34_s9), 0  ;;  %p1134_p8 = scmp.ne.s32.totalorder %s1128_s27, 0 }
  0x2f   : > { %p975_p6 = por %p49_p4, %p48_p2  ;;  %s38_s8 = ssub.s32 %s842_s22, %s1148_s9 }
  0x30   : > { %p981_p10 = por %p1134_p8, %p48_p2  ;;  %p634_p12 = scmp.lt.s32.totalorder %s846_s23, 2 }
  0x31   : > { %p39_p11 = scmp.eq.s32.totalorder %s38_s8, 0  ;;  %s220_s7 = sand.u32 1, %s834_s20  }
  0x32   : > { %s563_s14 = sshll.u32 %s220_s7, 3  ;;  %s564_s16 = sshll.u32 %s842_s22, 7 }
  0x33   : > { %s990_s15 = scalar_select %p39_p11, %s834_s20, %s41_s11  }
  0x34   : > { %s996_s25 = scalar_lea.hbm %s1117_s0, %s564_s16  ;;  %s224_s27 = scalar_lea.vmem [#allocation3], %s563_s14 }
  0x35   : > { %s231_s6 = sshll.u32 %s224_s27, 4  ;;  %p1002_p13 = pnand %p634_p12, %p975_p6  ;;  %s998_s6 = int_to_ptr.vmem [resolvable:$true] %s231_s6 }
  0x36   : > { %s221_s11 = scalar_lea.sflag [#allocation4], %s220_s7  ;;  %s730_s8 = scalar_lea.hbm %s996_s25, 128 }
  0x37   : > { %p731_p0 = scmp.ne.s32.totalorder %s996_s25, %s730_s8  ;;  %p732_p3 = pneg %p1002_p13 }
  0x38   : > { %s735_s17 = scalar_lea.hbm %s1117_s0, 256  ;;  %p736_p9 = scmp.lt.u32.totalorder %s996_s25, %s1117_s0 }
  0x39   : > { %p733_p5 = pnand %p732_p3, %p731_p0  ;;  %p737_p1 = scmp.lt.u32.totalorder %s735_s17, %s730_s8 }
  0x3a   : > { %p739_p4 = scmp.lt.u32.totalorder %s730_s8, %s996_s25 }
  0x3b   : > { %p734_p7 = pneg %p733_p5  ;;  %p738_p2 = por %p737_p1, %p736_p9 }
  0x3d   : > { %p740_p6 = por %p739_p4, %p738_p2 }
  0x3f   : > { %p741_p8 = pnand %p740_p6, %p734_p7 }
  0x41   : > { %744 = shalt.err (!%p741_p8)
}
  0x42   : > { %s745_s7 = scalar_lea.vmem %s998_s6, 128  ;;  %s851_s27 = smov [#allocation3]  }
  0x43   : > { %p746_p12 = scmp.ne.s32.totalorder %s998_s6, %s745_s7  ;;  %s750_s14 = sshll.u32 %s851_s27, 4  ;;  %s751_s14 = int_to_ptr.vmem [resolvable:$false] %s750_s14 }
  0x44   : > { %s752_s16 = scalar_lea.vmem %s751_s14, 256  ;;  %p753_p5 = scmp.lt.s32.totalorder %s998_s6, %s751_s14 }
  0x45   : > { %p748_p11 = pnand %p746_p12, %p732_p3  ;;  %p754_p9 = scmp.lt.s32.totalorder %s752_s16, %s745_s7 }
  0x47   : > { %p749_p0 = pneg %p748_p11  ;;  %p755_p1 = por %p754_p9, %p753_p5 }
  0x49   : > { %p756_p2 = pnand %p755_p1, %p749_p0 }
  0x4b   : > { %759 = shalt.err (!%p756_p2)
}
  0x4c   : > { %628 = dma.hbm_to_vmem [thread:$0]  (!%p1002_p13), %s996_s25, 128, %s998_s6, %s221_s11  }
  0x4d   : > { %p1137_p7 = scmp.ne.s32.totalorder %s1131_s30, 0 }
  0x4e   : > { %s1034_s8 = sand.u32 (!%p1137_p7), 1, %s830_s19   ;;  %p1138_p3 = scmp.ne.s32.totalorder (!%p1137_p7), %s1129_s28, 0 }
  0x4f   : > { %240 = sbr.rel (%p1137_p7) target bundleno = 657 (0x291), region = 40  ;;  %s566_s17 = sshll.u32 (!%p1137_p7), %s1034_s8, 3 }
  0x50   : > { %s243_s12 = scalar_lea.sflag (!%p1137_p7), [#allocation4], %s1034_s8  ;;  %s246_s24 = scalar_lea.vmem (!%p1137_p7), [#allocation3], %s566_s17 }
  0x56   : > { %813 = dma.done.wait (%p1138_p3), %s243_s12, 128  }
  0x57   : > { %815 = vsyncadd (%p1138_p3), %s243_s12, 4294967168  ;;  %p1139_p13 = scmp.ne.s32.totalorder %s1127_s26, 0 }
  0x59   : > { %817 = dma.done.wait (%p1139_p13), [#allocation7], 1024  }
  0x5a   : > { %819 = vsyncadd (%p1139_p13), [#allocation7], 4294966272  ;;  %v1048_v0 = vld [vmem:[%s246_s24] sm:$0xff]  ;;  %v690_v5 = vld [vmem:[#allocation6] sm:$0xff]   ;;  %v852_v6 = vmov 0.0   ;;  %vm853_vm0 = vmmov 0  }
  0x5b   : > { %289 = vadd.xlane.f32.xlu0 %v1048_v0  ;;  %593 = vmatprep.subr.bf16.mxu0 %v852_v6  ;;  %v691_v7 = vld [vmem:[#allocation6 + $0x8] sm:$0xff]   ;;  %v692_v8 = vld [vmem:[#allocation6 + $0x10] sm:$0xff]   ;;  %v693_v9 = vld [vmem:[#allocation6 + $0x18] sm:$0xff]   ;;  %s581_s11 = sshll.u32 %s838_s21, 7  ;;  %s279_s7 = scalar_lea.vmem [#allocation8], %s566_s17 }
  0x5c   : > { %594 = vmatpush3.bf16.msra.mxu0 %v690_v5  ;;  %v694_v10 = vld [vmem:[#allocation6 + $0x20] sm:$0xff]   ;;  %v695_v11 = vld [vmem:[#allocation6 + $0x28] sm:$0xff]   ;;  %v696_v12 = vld [vmem:[#allocation6 + $0x30] sm:$0xff]   ;;  %609 = vmatprep.mubr.msk.bf16.mxu0 %vm853_vm0, %v852_v6  ;;  %s456_s27 = sshll.u32 %s279_s7, 4  ;;  %s1068_s12 = scalar_lea.hbm %s1122_s5, %s581_s11  ;;  %s1070_s27 = int_to_ptr.vmem [resolvable:$true] %s456_s27 }
  0x5d   : > { %595 = vmatprep.subr.bf16.mxu0 %v852_v6  ;;  %v697_v13 = vld [vmem:[#allocation6 + $0x38] sm:$0xff]   ;;  %v569_v23 = vld [vmem:[%s1118_s1] ss:$0 sm:$0xff]  ;;  %s442_s21 = scalar_lea.sflag [#allocation5], %s1034_s8  ;;  %s760_s17 = scalar_lea.vmem %s1070_s27, 128 }
  0x5e   : > { %v570_v25 = vld [vmem:[%s1119_s2] ss:$0 sm:$0xff]  ;;  %p761_p4 = scmp.ne.s32.totalorder %s1070_s27, %s760_s17  ;;  %s854_s24 = smov [#allocation8]  }
  0x5f   : > { %v571_v30 = vld [vmem:[%s1121_s4] ss:$0 sm:$0xff]  ;;  %s764_s26 = sshll.u32 %s854_s24, 4  ;;  %s765_s26 = int_to_ptr.vmem [resolvable:$false] %s764_s26 }
  0x60   : > { %596 = vmatpush3.bf16.msra.mxu0 %v691_v7  ;;  %p762_p6 = pnand %p761_p4, %p981_p10  ;;  %s766_s28 = scalar_lea.vmem %s765_s26, 256 }
  0x61   : > { %597 = vmatprep.subr.bf16.mxu0 %v852_v6  ;;  %p767_p12 = scmp.lt.s32.totalorder %s1070_s27, %s765_s26  ;;  %p768_p11 = scmp.lt.s32.totalorder %s766_s28, %s760_s17 }
  0x62   : > { %p763_p8 = pneg %p762_p6 }
  0x63   : > { %p769_p0 = por %p768_p11, %p767_p12 }
  0x64   : > { %598 = vmatpush3.bf16.msra.mxu0 %v692_v8 }
  0x65   : > { %599 = vmatprep.subr.bf16.mxu0 %v852_v6  ;;  %p770_p5 = pnand %p769_p0, %p763_p8 }
  0x68   : > { %600 = vmatpush3.bf16.msra.mxu0 %v693_v9 }
  0x69   : > { %601 = vmatprep.subr.bf16.mxu0 %v852_v6 }
  0x6c   : > { %602 = vmatpush3.bf16.msra.mxu0 %v694_v10 }
  0x6d   : > { %603 = vmatprep.subr.bf16.mxu0 %v852_v6 }
  0x70   : > { %604 = vmatpush3.bf16.msra.mxu0 %v695_v11 }
  0x71   : > { %605 = vmatprep.subr.bf16.mxu0 %v852_v6 }
  0x74   : > { %606 = vmatpush3.bf16.msra.mxu0 %v696_v12 }
  0x75   : > { %607 = vmatprep.subr.bf16.mxu0 %v852_v6 }
  0x78   : > { %608 = vmatpush3.bf16.msra.mxu0 %v697_v13 }
  0xe8   : > { %v290_v1 = vpop.xlane.xlu0 %289 }
  0xe9   : > { %v292_v2 = vmul.f32 0.0078125, %v290_v1 }
  0xeb   : > { %v293_v3 = vsub.f32 %v1048_v0, %v292_v2 }
  0xed   : > { %v294_v4 = vmul.f32 %v293_v3, %v293_v3 }
  0xef   : > { %295 = vadd.xlane.f32.xlu0 %v294_v4 }
 0x17c   : > { %v296_v14 = vpop.xlane.xlu0 %295 }
 0x17d   : > { %v297_v15 = vmul.f32 0.007874016, %v296_v14 }
 0x17f   : > { %698 = vrsqrt.f32 %v297_v15  ;;  %vm300_vm1 = vcmp.eq.f32.partialorder %v297_v15, inf  ;;  %v303_v18 = vand.u32 2147483648, %v297_v15  ;;  %vm302_vm2 = vcmp.eq.f32.partialorder %v297_v15, 0.0 }
 0x189   : > { %v699_v16 = vpop.eup %698 }
 0x18a   : > { %v299_v17 = vmul.f32 %v699_v16, %v297_v15 }
 0x18c   : > { %v301_v19 = vsel %vm300_vm1, %v297_v15, %v299_v17 }
 0x18d   : > { %v304_v20 = vsel %vm302_vm2, %v303_v18, %v301_v19 }
 0x18e   : > { %v305_v21 = vadd.f32 1e-06, %v304_v20 }
 0x190   : > { %700 = vrcp.f32 %v305_v21 }
 0x19a   : > { %v701_v22 = vpop.eup %700 }
 0x19b   : > { %v308_v24 = vmul.f32 %v701_v22, %v293_v3 }
 0x19d   : > { %v315_v26 = vmul.f32 %v569_v23, %v308_v24 }
 0x19f   : > { %v323_v27 = vadd.f32 %v570_v25, %v315_v26 }
 0x1a1   : > { %v324_v28 = vpack.c.bf16 %v323_v27, %v323_v27 }
 0x1a3   : > { %325 = vst [vmem:[#allocation2] sm:$0xf] %v324_v28 }
 0x1aa   : > { %v326_v29 = vld [vmem:[#allocation2] sm:$0xf] }
 0x1ab   : > { %610 = vmatmul.mubr.bf16.vlgmr.msra.gmra.mrb[0].mxu0 %v326_v29 }
 0x27e   : > { %v432_v31 = vpop.f32.mrb[0].mxu0 }
 0x27f   : > { %v433_v32 = vadd.f32 %v571_v30, %v432_v31  ;;  %v611_v33 = vpop.f32.mrb[1].mxu0 }
 0x280   : > { %v435_v34 = vpop.f32.mrb[2].mxu0 }
 0x281   : > { %v439_v35 = vadd.f32 %v433_v32, %v1048_v0  ;;  %v612_v36 = vpop.f32.mrb[3].mxu0 }
 0x283   : > { %440 = vst [vmem:[%s279_s7] sm:$0xff] %v439_v35 }
 0x284   : > { %773 = shalt.err (!%p770_p5)
}
 0x285   : > { %s774_s8 = scalar_lea.hbm %s1068_s12, 128  ;;  %s778_s6 = scalar_lea.hbm %s1122_s5, 256 }
 0x286   : > { %p775_p9 = scmp.ne.s32.totalorder %s1068_s12, %s774_s8  ;;  %p779_p7 = scmp.lt.u32.totalorder %s1068_s12, %s1122_s5 }
 0x287   : > { %p780_p3 = scmp.lt.u32.totalorder %s778_s6, %s774_s8  ;;  %p782_p4 = scmp.lt.u32.totalorder %s774_s8, %s1068_s12 }
 0x288   : > { %p776_p1 = pnand %p775_p9, %p981_p10 }
 0x289   : > { %p781_p13 = por %p780_p3, %p779_p7 }
 0x28a   : > { %p777_p2 = pneg %p776_p1 }
 0x28b   : > { %p783_p6 = por %p782_p4, %p781_p13 }
 0x28d   : > { %p784_p8 = pnand %p783_p6, %p777_p2 }
 0x28f   : > { %787 = shalt.err (!%p784_p8)
}
 0x290   : > { %619 = dma.vmem_to_hbm [thread:$0]  (%p981_p10), %s1070_s27, 128, %s1068_s12, %s442_s21  }
 0x291 PF: > { %s468_s7 = sand.u32 1, %s826_s18   ;;  %p1140_p12 = scmp.ne.s32.totalorder %s1130_s29, 0 }
 0x292   : > { %p1141_p11 = scmp.ge.s32.totalorder %s846_s23, 2  ;;  %s469_s14 = scalar_lea.sflag [#allocation5], %s468_s7 }
 0x294   : > { %p630_p0 = pnand %p1141_p11, %p1140_p12 }
 0x296   : > { %821 = dma.done.wait (!%p630_p0), %s469_s14, 128  }
 0x297   : > { %823 = vsyncadd (!%p630_p0), %s469_s14, 4294967168  ;;  %s22_s23 = sadd.s32 1, %s846_s23   ;;  %s1142_s18 = smov %s830_s19 }
 0x298   : > { %p19_p5 = scmp.ge.s32.totalorder %s22_s23, 4   ;;  %s1143_s19 = smov %s834_s20 }
 0x299   : > { %s1144_s20 = smov %s990_s15  ;;  %s1145_s21 = smov %s842_s22 }
 0x29a   : > { %s1146_s22 = smov %s1148_s9  ;;  %21 = sbr.rel (!%p19_p5) target bundleno = 7 (0x7), region = 96 }
 0x2a1   :  { %474 = vsyncpa [#allocation4], 1 }
 0x2a2   :  { %476 = vsyncpa [#allocation4 + $0x1], 1 }
 0x2a3   :  { %477 = vsyncpa [#allocation7], 1 }
 0x2a4   :  { %478 = vsyncpa [#allocation5], 1 }
 0x2a5   :  { %480 = vsyncpa [#allocation5 + $0x1], 1 }

</bundles_post_ra>
